<compile_context>
chip_gen: v5e
topology: v5e:2x2
jax: 0.10.0
libtpu: 0.0.40
codegen_flags: <defaults>
</compile_context>

<pallas_src>
import functools

import jax
import jax.numpy as jnp
from jax import lax
from jax.experimental import pallas as pl
from jax.experimental.pallas import tpu as pltpu


def _batch_loop(body, nb):
    """Run body(b) for b in [0, nb): static unroll for small nb, fori_loop otherwise."""
    if nb <= 4:
        for b in range(nb):
            body(b)
    else:
        def step(b, carry):
            body(b)
            return carry
        lax.fori_loop(0, nb, step, 0)


def _composed_kernel(x_ref, w_ref, beff_ref, o_ref, *, taps, nb, tlo, mxu_dtype):
    """Whole separable conv as K accumulated MXU matmuls over shifted windows.

    x_ref   : (NB, S, C_in, L_dec)  phase-decimated, zero-padded input tile
    w_ref   : (K, C_out, C_in)      composed weights  w[k, o, i] = pw[o, i] * dw[i, k]
    beff_ref: (C_out, 1)            folded bias  (pw @ db + pb), f32
    o_ref   : (NB, C_out, TLO)      output block (TLO % 128 == 0 -> unmasked stores)
    """
    c_out = o_ref.shape[1]
    bias = beff_ref[...].astype(jnp.float32)
    w = w_ref[...]
    if mxu_dtype is not None and w.dtype != mxu_dtype:
        w = w.astype(mxu_dtype)

    def body(b):
        acc = jnp.zeros((c_out, tlo), jnp.float32)
        for k, (phase, off) in enumerate(taps):
            win = x_ref[b, phase, :, pl.ds(off, tlo)]          # (C_in, TLO), unit stride
            if mxu_dtype is not None and win.dtype != mxu_dtype:
                win = win.astype(mxu_dtype)
            acc = acc + jnp.dot(w[k], win, preferred_element_type=jnp.float32)
        o_ref[b] = (acc + bias).astype(o_ref.dtype)

    _batch_loop(body, nb)


def _separable_kernel(x_ref, dw_ref, pw_ref, beff_ref, o_ref, *, taps, nb, tlo, mxu_dtype):
    """Fallback for large channel counts: f32 VPU FIR + one pointwise MXU matmul per batch."""
    c_in = dw_ref.shape[0]
    bias = beff_ref[...].astype(jnp.float32)
    pw = pw_ref[...]
    if mxu_dtype is not None and pw.dtype != mxu_dtype:
        pw = pw.astype(mxu_dtype)
    dwf = dw_ref[...].astype(jnp.float32)                      # (C_in, K), loaded once

    def body(b):
        acc = jnp.zeros((c_in, tlo), jnp.float32)
        for k, (phase, off) in enumerate(taps):
            win = x_ref[b, phase, :, pl.ds(off, tlo)].astype(jnp.float32)
            acc = acc + dwf[:, k:k + 1] * win
        y = acc if mxu_dtype is None else acc.astype(mxu_dtype)
        out = jnp.dot(pw, y, preferred_element_type=jnp.float32) + bias
        o_ref[b] = out.astype(o_ref.dtype)

    _batch_loop(body, nb)


def separable_conv1d(x, dw, db, pw, pb, *, stride=1, padding=0, dilation=1,
                     mxu_dtype=jnp.bfloat16):
    """x: (N, C_in, L); dw: (C_in, K); db: (C_in, 1); pw: (C_out, C_in); pb: (C_out, 1).

    Returns (N, C_out, L_out), matching PyTorch SeparableConv1d.forward.
    `mxu_dtype` is the dtype of the MXU operands (bf16 default, None -> keep f32);
    accumulation is always f32.
    """
    n, c_in, l = x.shape
    c_out = pw.shape[0]
    ksz = dw.shape[1]
    l_out = (l + 2 * padding - dilation * (ksz - 1) - 1) // stride + 1
    assert l_out > 0, "invalid conv geometry"

    # Lane-dense output length (multiple of 128 -> unmasked full-lane stores).
    tlo = -(-l_out // 128) * 128
    # TODO(synk): for l_out << 128, pack several batch rows into one 128-lane
    # group instead of padding every row's length up to 128.

    # Phase decomposition of the strided taps: tap k of output column j reads
    # x_pad[j*stride + k*dilation] = x_dec[phase_k, :, j + off_k], so the kernel
    # only ever issues unit-stride lane windows (no lane-strided loads).
    taps = tuple(((k * dilation) % stride, (k * dilation) // stride)
                 for k in range(ksz))
    off_max = max(off for _, off in taps)
    l_dec = off_max + tlo                        # decimated length per phase
    l_need = l_dec * stride

    # Zero-pad: conv padding + right padding so every (padded) tap stays in range.
    x_p = jnp.pad(x, ((0, 0), (0, 0), (padding, padding)))
    l_total = -(-max(x_p.shape[2], l_need) // stride) * stride
    if l_total > x_p.shape[2]:
        x_p = jnp.pad(x_p, ((0, 0), (0, 0), (0, l_total - x_p.shape[2])))
    # (N, S, C_in, L_dec): keep (C_in, L_dec) as the tiled minor dims.  For
    # stride == 1 the transpose is a pure reshape (no data movement).
    x_dec = x_p.reshape(n, c_in, l_total // stride, stride)
    x_dec = x_dec.transpose(0, 3, 1, 2)[:, :, :, :l_dec]

    # Batch tiling: aim for >= 8 grid steps (>= 4 per TensorCore on v7x) so the
    # software pipeline has blocks to overlap; cap input blocks at ~2 MiB and
    # keep double-buffered input + output inside a generation-aware VMEM budget.
    itemsize = x.dtype.itemsize
    per_batch_in = c_in * stride * l_dec * itemsize
    per_batch_out = c_out * tlo * itemsize
    per_batch_pipe = 2 * (per_batch_in + per_batch_out)        # double-buffered
    try:
        vmem_cap = int(pltpu.get_tpu_info().vmem_capacity_bytes)
    except Exception:
        vmem_cap = 64 * 1024 * 1024                            # v7x worst case
    vmem_limit = int(max(16 << 20, min(vmem_cap * 3 // 4, 96 << 20)))
    budget = vmem_limit // 2                                   # headroom for weights etc.
    nb_vmem = max(1, budget // max(per_batch_pipe, 1))
    nb_blk = max(1, (2 << 20) // max(per_batch_in, 1))
    nb_steps = max(1, n // 8) if n >= 8 else 1
    nb = int(max(1, min(nb_steps, nb_vmem, nb_blk)))
    num_tiles = -(-n // nb)
    n_pad = num_tiles * nb
    if n_pad > n:
        x_dec = jnp.pad(x_dec, ((0, n_pad - n), (0, 0), (0, 0), (0, 0)))

    # Fold the depthwise bias into the pointwise bias: z = pw @ (y + db) + pb.
    pw32 = pw.astype(jnp.float32)
    b_eff = jnp.dot(pw32, db.astype(jnp.float32)) + pb.astype(jnp.float32)   # (C_out, 1)

    # Small channel counts: compose W[k] = pw * dw[:, k] and run the whole op as
    # K accumulated MXU matmuls (no VPU FIR, no intermediate).  Large channel
    # counts keep the depthwise FIR + single pointwise matmul.
    use_composed = (c_in <= 256 and c_out <= 256)
    if use_composed:
        w_eff = pw32[None, :, :] * dw.astype(jnp.float32).T[:, None, :]      # (K, C_out, C_in)
        if mxu_dtype is not None:
            w_eff = w_eff.astype(mxu_dtype)
        kernel = functools.partial(_composed_kernel, taps=taps, nb=nb,
                                   tlo=tlo, mxu_dtype=mxu_dtype)
        weight_args = (w_eff,)
        weight_specs = [pl.BlockSpec((ksz, c_out, c_in), lambda t: (0, 0, 0))]
    else:
        kernel = functools.partial(_separable_kernel, taps=taps, nb=nb,
                                   tlo=tlo, mxu_dtype=mxu_dtype)
        weight_args = (dw, pw)
        weight_specs = [pl.BlockSpec((c_in, ksz), lambda t: (0, 0)),
                        pl.BlockSpec((c_out, c_in), lambda t: (0, 0))]

    out = pl.pallas_call(
        kernel,
        out_shape=jax.ShapeDtypeStruct((n_pad, c_out, tlo), x.dtype),
        grid_spec=pltpu.PrefetchScalarGridSpec(
            num_scalar_prefetch=0,
            grid=(num_tiles,),
            in_specs=[pl.BlockSpec((nb, stride, c_in, l_dec),
                                   lambda t: (t, 0, 0, 0))]
                     + weight_specs
                     + [pl.BlockSpec((c_out, 1), lambda t: (0, 0))],
            out_specs=pl.BlockSpec((nb, c_out, tlo), lambda t: (t, 0, 0)),
        ),
        compiler_params=pltpu.CompilerParams(
            dimension_semantics=("parallel",),
            vmem_limit_bytes=vmem_limit),
    )(x_dec, *weight_args, b_eff)

    # Output already lands in (N, C_out, TLO) layout; only trim padded tails.
    if n_pad != n or tlo != l_out:
        out = out[:n, :, :l_out]
    return out


def _reference(x, dw, db, pw, pb, *, stride, padding, dilation):
    """Pure-JAX reference matching PyTorch Conv1d semantics."""
    c_in = x.shape[1]
    dw3 = dw[:, None, :]                      # (C_in, 1, K)  (O, I/groups, W)
    y = jax.lax.conv_general_dilated(
        x, dw3, window_strides=(stride,), padding=[(padding, padding)],
        rhs_dilation=(dilation,), feature_group_count=c_in,
        dimension_numbers=("NCH", "OIH", "NCH"))
    y = y + db[None, :, :]
    pw3 = pw[:, :, None]                      # (C_out, C_in, 1)
    z = jax.lax.conv_general_dilated(
        y, pw3, window_strides=(1,), padding=[(0, 0)],
        dimension_numbers=("NCH", "OIH", "NCH"))
    return z + pb[None, :, :]


if __name__ == "__main__":
    key = jax.random.PRNGKey(0)

    configs = [
        # (batch, c_in, c_out, length, kernel, stride, padding, dilation, check_f32)
        (2, 8, 16, 32, 3, 1, 1, 1, True),     # basic
        (3, 8, 16, 40, 5, 1, 2, 2, False),    # dilation > 1, odd batch
        (2, 8, 16, 33, 3, 2, 1, 1, True),     # stride > 1 -> phase decimation
        (17, 8, 16, 32, 3, 1, 1, 1, False),   # nb = 2, padded batch tail
        (40, 8, 16, 32, 3, 1, 1, 1, False),   # nb = 5 -> fori_loop batch loop
        (2, 320, 48, 32, 3, 1, 1, 1, True),   # c_in > 256 -> separable fallback path
    ]
    for cfg in configs:
        batch, c_in, c_out, length, ksz, stride, padding, dilation, check_f32 = cfg
        key, kx, kdw, kdb, kpw, kpb = jax.random.split(key, 6)
        x = jax.random.normal(kx, (batch, c_in, length), dtype=jnp.float32)
        # conv1: Conv1d(C_in, C_in, K, groups=C_in) -> weight (C_in, 1, K), bias (C_in,)
        dw = 0.1 * jax.random.normal(kdw, (c_in, ksz), dtype=jnp.float32)
        db = 0.1 * jax.random.normal(kdb, (c_in, 1), dtype=jnp.float32)
        # point_wise: Conv1d(C_in, C_out, 1) -> weight (C_out, C_in, 1), bias (C_out,)
        pw = 0.1 * jax.random.normal(kpw, (c_out, c_in), dtype=jnp.float32)
        pb = 0.1 * jax.random.normal(kpb, (c_out, 1), dtype=jnp.float32)

        ref = _reference(x, dw, db, pw, pb,
                         stride=stride, padding=padding, dilation=dilation)

        # Default path: bf16 MXU operands, f32 accumulation.
        out = separable_conv1d(x, dw, db, pw, pb,
                               stride=stride, padding=padding, dilation=dilation)
        out = jax.block_until_ready(out)
        assert out.shape == ref.shape, (out.shape, ref.shape)
        assert jnp.allclose(out, ref, atol=5e-2, rtol=5e-2), f"mismatch (bf16 MXU) cfg={cfg}"

        if check_f32:
            out32 = separable_conv1d(x, dw, db, pw, pb,
                                     stride=stride, padding=padding,
                                     dilation=dilation, mxu_dtype=None)
            out32 = jax.block_until_ready(out32)
            assert jnp.allclose(out32, ref, atol=1e-3, rtol=1e-3), f"mismatch (f32 MXU) cfg={cfg}"

    print("KERNEL_OK")
</pallas_src>

<mosaic_0001>
module attributes {stable_mosaic.version = 11 : i64} {
  func.func @_composed_kernel(%arg0: i32, %arg1: memref<1x1x8x130xf32, #tpu.memory_space<vmem>>, %arg2: memref<3x16x8xbf16, #tpu.memory_space<vmem>>, %arg3: memref<16x1xf32, #tpu.memory_space<vmem>>, %arg4: memref<1x16x128xf32, #tpu.memory_space<vmem>>) attributes {dimension_semantics = [#tpu.dimension_semantics<parallel>], iteration_bounds = array<i64: 2>, scalar_prefetch = 0 : i64, scratch_operands = 0 : i64, tpu.core_type = #tpu.core_type<tc>, window_params = [{transform_indices = @transform_0, window_bounds = array<i64: 1, 1, 8, 130>}, {pipeline_mode = #tpu.pipeline_mode<synchronous>, transform_indices = @transform_1, window_bounds = array<i64: 3, 16, 8>}, {pipeline_mode = #tpu.pipeline_mode<synchronous>, transform_indices = @transform_2, window_bounds = array<i64: 16, 1>}, {transform_indices = @transform_3, window_bounds = array<i64: 1, 16, 128>}]} {
    %c0 = arith.constant 0 : index
    %c0_0 = arith.constant 0 : index
    %0 = vector.load %arg3[%c0, %c0_0] : memref<16x1xf32, #tpu.memory_space<vmem>>, vector<16x1xf32>
    %c0_1 = arith.constant 0 : index
    %c0_2 = arith.constant 0 : index
    %c0_3 = arith.constant 0 : index
    %1 = vector.load %arg2[%c0_1, %c0_2, %c0_3] : memref<3x16x8xbf16, #tpu.memory_space<vmem>>, vector<3x16x8xbf16>
    %cst = arith.constant 0.000000e+00 : f32
    %2 = vector.broadcast %cst : f32 to vector<16x128xf32>
    %c0_4 = arith.constant 0 : index
    %c0_5 = arith.constant 0 : index
    %c0_6 = arith.constant 0 : index
    %c0_7 = arith.constant 0 : index
    %3 = vector.load %arg1[%c0_4, %c0_5, %c0_6, %c0_7] : memref<1x1x8x130xf32, #tpu.memory_space<vmem>>, vector<1x1x8x128xf32>
    %4 = vector.shape_cast %3 : vector<1x1x8x128xf32> to vector<8x128xf32>
    %5 = arith.truncf %4 : vector<8x128xf32> to vector<8x128xbf16>
    %6 = vector.extract_strided_slice %1 {offsets = [0, 0, 0], sizes = [1, 16, 8], strides = [1, 1, 1]} : vector<3x16x8xbf16> to vector<1x16x8xbf16>
    %7 = vector.shape_cast %6 : vector<1x16x8xbf16> to vector<16x8xbf16>
    %cst_8 = arith.constant dense<0.000000e+00> : vector<16x128xf32>
    %8 = tpu.matmul %7, %5, %cst_8 {dimension_numbers = #tpu.dot_dimension_numbers<[1], [0], [0], [1], [0, 0, 1, 1], [], []>} : vector<16x8xbf16>, vector<8x128xbf16>, vector<16x128xf32> -> vector<16x128xf32>
    %9 = arith.addf %2, %8 : vector<16x128xf32>
    %c0_9 = arith.constant 0 : index
    %c0_10 = arith.constant 0 : index
    %c0_11 = arith.constant 0 : index
    %c1 = arith.constant 1 : index
    %10 = vector.load %arg1[%c0_9, %c0_10, %c0_11, %c1] : memref<1x1x8x130xf32, #tpu.memory_space<vmem>>, vector<1x1x8x128xf32>
    %11 = vector.shape_cast %10 : vector<1x1x8x128xf32> to vector<8x128xf32>
    %12 = arith.truncf %11 : vector<8x128xf32> to vector<8x128xbf16>
    %13 = vector.extract_strided_slice %1 {offsets = [1, 0, 0], sizes = [1, 16, 8], strides = [1, 1, 1]} : vector<3x16x8xbf16> to vector<1x16x8xbf16>
    %14 = vector.shape_cast %13 : vector<1x16x8xbf16> to vector<16x8xbf16>
    %cst_12 = arith.constant dense<0.000000e+00> : vector<16x128xf32>
    %15 = tpu.matmul %14, %12, %cst_12 {dimension_numbers = #tpu.dot_dimension_numbers<[1], [0], [0], [1], [0, 0, 1, 1], [], []>} : vector<16x8xbf16>, vector<8x128xbf16>, vector<16x128xf32> -> vector<16x128xf32>
    %16 = arith.addf %9, %15 : vector<16x128xf32>
    %c0_13 = arith.constant 0 : index
    %c0_14 = arith.constant 0 : index
    %c0_15 = arith.constant 0 : index
    %c2 = arith.constant 2 : index
    %17 = vector.load %arg1[%c0_13, %c0_14, %c0_15, %c2] : memref<1x1x8x130xf32, #tpu.memory_space<vmem>>, vector<1x1x8x128xf32>
    %18 = vector.shape_cast %17 : vector<1x1x8x128xf32> to vector<8x128xf32>
    %19 = arith.truncf %18 : vector<8x128xf32> to vector<8x128xbf16>
    %20 = vector.extract_strided_slice %1 {offsets = [2, 0, 0], sizes = [1, 16, 8], strides = [1, 1, 1]} : vector<3x16x8xbf16> to vector<1x16x8xbf16>
    %21 = vector.shape_cast %20 : vector<1x16x8xbf16> to vector<16x8xbf16>
    %cst_16 = arith.constant dense<0.000000e+00> : vector<16x128xf32>
    %22 = tpu.matmul %21, %19, %cst_16 {dimension_numbers = #tpu.dot_dimension_numbers<[1], [0], [0], [1], [0, 0, 1, 1], [], []>} : vector<16x8xbf16>, vector<8x128xbf16>, vector<16x128xf32> -> vector<16x128xf32>
    %23 = arith.addf %16, %22 : vector<16x128xf32>
    %24 = vector.broadcast %0 : vector<16x1xf32> to vector<16x128xf32>
    %25 = arith.addf %23, %24 : vector<16x128xf32>
    %c0_17 = arith.constant 0 : index
    %c0_18 = arith.constant 0 : index
    %c0_19 = arith.constant 0 : index
    %26 = vector.load %arg4[%c0_17, %c0_18, %c0_19] : memref<1x16x128xf32, #tpu.memory_space<vmem>>, vector<1x16x128xf32>
    %27 = vector.shape_cast %26 : vector<1x16x128xf32> to vector<16x128xf32>
    %28 = vector.shape_cast %25 : vector<16x128xf32> to vector<1x16x128xf32>
    tpu.vector_store %arg4[%c0_17, %c0_18, %c0_19], %28 {strides = array<i32>} : memref<1x16x128xf32, #tpu.memory_space<vmem>>, vector<1x16x128xf32>,
    return
  }
  func.func @transform_0(%arg0: i32) -> (i32, i32, i32, i32) {
    %c0_i32 = arith.constant 0 : i32
    %c0_i32_0 = arith.constant 0 : i32
    %c0_i32_1 = arith.constant 0 : i32
    %c0_i32_2 = arith.constant 0 : i32
    return %arg0, %c0_i32, %c0_i32_0, %c0_i32_1 : i32, i32, i32, i32
  }
  func.func @transform_1(%arg0: i32) -> (i32, i32, i32) {
    %c0_i32 = arith.constant 0 : i32
    %c0_i32_0 = arith.constant 0 : i32
    %c0_i32_1 = arith.constant 0 : i32
    %c0_i32_2 = arith.constant 0 : i32
    return %c0_i32, %c0_i32_0, %c0_i32_1 : i32, i32, i32
  }
  func.func @transform_2(%arg0: i32) -> (i32, i32) {
    %c0_i32 = arith.constant 0 : i32
    %c0_i32_0 = arith.constant 0 : i32
    %c0_i32_1 = arith.constant 0 : i32
    return %c0_i32, %c0_i32_0 : i32, i32
  }
  func.func @transform_3(%arg0: i32) -> (i32, i32, i32) {
    %c0_i32 = arith.constant 0 : i32
    %c0_i32_0 = arith.constant 0 : i32
    %c0_i32_1 = arith.constant 0 : i32
    return %arg0, %c0_i32, %c0_i32_0 : i32, i32, i32
  }
}

</mosaic_0001>

<bundles_post_ra>
// kernel: tpu_custom_call.1
= control target key start
LH: loop header
LB: loop body
LE: loop exit
PB: predicated region body
PF: predicated region fallthrough
CT: control target
= control target key end

     0   :  { %8 = vsyncpa [#allocation3], 0  ;;  %s640_s0 = inlined_call_operand.vmem [shape: f32[2,1,8,130], index: 0, kind: input, shape index: {}]   ;;  %s641_s1 = inlined_call_operand.vmem [shape: bf16[3,16,8], index: 1, kind: input, shape index: {}]   ;;  %s642_s2 = inlined_call_operand.vmem [shape: f32[16,1], index: 2, kind: input, shape index: {}]   ;;  %s643_s3 = inlined_call_operand.hbm [shape: f32[2,16,128], index: 3, kind: output, shape index: {}]  }
   0x1   :  { %10 = vsyncpa [#allocation3 + $0x1], 0  ;;  %s534_s12 = smov 0   ;;  %s536_s13 = smov 0  }
   0x2   :  { %s538_s14 = smov 0   ;;  %s540_s15 = smov 0  }
   0x3 LB: > { %s555_s16 = sadd.s32 4294967295, %s507_s15   ;;  %s367_s17 = sadd.s32 4294967294, %s507_s15   ;;  %s507_s15 = sphi %s540_s15, %s649_s15   ;;  %s503_s14 = sphi %s538_s14, %s648_s14   ;;  %s499_s13 = sphi %s536_s13, %s647_s13   ;;  %s495_s12 = sphi %s534_s12, %s646_s12  }
   0x4   : > { %s559_s18 = sadd.s32 1, %s507_s15   ;;  %s91_s19 = sadd.s32 1, %s503_s14 }
   0x5   : > { %s88_s20 = ssub.s32 %s507_s15, %s559_s18  ;;  %p101_p0 = scmp.ne.s32.totalorder %s503_s14, %s499_s13 }
   0x6   : > { %p89_p1 = scmp.eq.s32.totalorder %s88_s20, 0  ;;  %p102_p2 = scmp.eq.s32.totalorder %s555_s16, 1 }
   0x7   : > { %p107_p3 = scmp.ne.s32.totalorder %s499_s13, %s495_s12  ;;  %p108_p4 = scmp.eq.s32.totalorder %s367_s17, 1 }
   0x8   : > { %s570_s21 = scalar_select %p89_p1, %s503_s14, %s91_s19  }
   0x9   : > { %p572_p5 = por %p102_p2, %p101_p0  ;;  %p576_p6 = por %p108_p4, %p107_p3 }
   0xa   : > { %p370_p7 = scmp.ge.s32.totalorder %s507_s15, 1  ;;  %p140_p8 = scmp.lt.s32.totalorder %s507_s15, 3 }
   0xc   : > { %p141_p9 = pnand %p370_p7, %p140_p8 }
   0xd   : > { %p164_p10 = scmp.lt.s32.totalorder (!%p141_p9), %s555_s16, 1  ;;  %s509_s29 = smov (!%p141_p9), 127  }
   0xe   : > { %144 = sbr.rel (%p141_p9) target bundleno = 302 (0x12e), region = 32  ;;  %s510_s30 = smov (!%p141_p9), 126  }
   0xf   : > { %s161_s20 = sand.u32 (!%p141_p9), 1, %s499_s13   ;;  %s465_s9 = scalar_lea.hbm (!%p141_p9), %s643_s3, 32 }
  0x13   : > { %s165_s24 = scalar_select %p164_p10, %s555_s16, 1  ;;  %vm199_vm0 = vcmask 1043456   ;;  %v395_v5 = vld [vmem:[%s641_s1] sm:$0xff]  ;;  %vm195_vm1 = vcmask 64512   ;;  %v511_v7 = vmov 0   ;;  %v171_v8 = vld [vmem:[%s642_s2 + $0x8] sm:$0xff] }
  0x14   : > { %v170_v6 = vld [vmem:[%s642_s2] sm:$0xff]  ;;  %443 = vset.pattern.permute.xlu2 %v511_v7  ;;  %444 = vset.pattern.permute.xlu0 %v511_v7  ;;  %vm193_vm2 = vcmask 1039360   ;;  %vm251_vm3 = vcmask 1031168   ;;  %v396_v17 = vld [vmem:[%s641_s1 + $0x8] sm:$0xff]  ;;  %v397_v18 = vld [vmem:[%s641_s1 + $0x10] sm:$0xff] }
  0x15   : > { %s394_s25 = sshll.u32 %s165_s24, 4  ;;  %277 = vperm.xlu2 %443, %v170_v6   ;;  %s371_s24 = sshll.u32 %s161_s20, 4 }
  0x16   : > { %s168_s28 = scalar_lea.vmem %s640_s0, %s394_s25  ;;  %s398_s25 = sshll.u32 %s555_s16, 4 }
  0x17   : > { %v178_v0 = vld [vmem:[%s168_s28] sm:$0xff]  ;;  %v180_v2 = vld [vmem:[%s168_s28 + $0x8] sm:$0xff]  ;;  %s301_s28 = scalar_lea.hbm %s643_s3, %s398_s25  ;;  %s290_s16 = scalar_lea.sflag [#allocation3], %s161_s20 }
  0x18   : > { %v179_v1 = vpack.c.bf16 %v178_v0, %v178_v0  ;;  %v181_v3 = vpack.c.bf16 %v180_v2, %v180_v2  ;;  %s304_s4 = sshll.u32 %s301_s28, 4  ;;  %s305_s4 = int_to_ptr.hbm [resolvable:$true] %s304_s4 }
  0x19   : > { %s459_s5 = sshra.s32 %s305_s4, 4  ;;  %s460_s5 = int_to_ptr.hbm [resolvable:$true] %s459_s5 }
  0x1a   : > { %189 = vrot.lane.b32.xlu1 %v179_v1, %s509_s29  ;;  %247 = vrot.lane.b32.xlu0 %v179_v1, %s510_s30  ;;  %v226_v4 = vsel %vm199_vm0, %v179_v1, 0  ;;  %s461_s6 = scalar_lea.hbm %s460_s5, 16  ;;  %p466_p0 = scmp.lt.s32.totalorder %s460_s5, %s643_s3 }
  0x1b   : > { %235 = vmatpush.bf16.msra.mxu1 %v226_v4  ;;  %p462_p11 = scmp.ne.s32.totalorder %s460_s5, %s461_s6  ;;  %p467_p1 = scmp.lt.s32.totalorder %s465_s9, %s461_s6 }
  0x1d   : > { %282 = vperm.xlu2 %443, %v171_v8   ;;  %p463_p12 = pnand %p462_p11, %p572_p5  ;;  %p468_p2 = por %p467_p1, %p466_p0 }
  0x1e   : > { %383 = vmatmul.msk.bf16.vlgmr.msra.gmra.mxu1 %vm195_vm1, %v395_v5 }
  0x1f   : > { %p464_p13 = pneg %p463_p12 }
  0x21   : > { %p469_p3 = pnand %p468_p2, %p464_p13 }
  0x22   : > { %191 = vrot.lane.b32.xlu1 %v181_v3, %s509_s29  ;;  %249 = vrot.lane.b32.xlu0 %v181_v3, %s510_s30  ;;  %s163_s29 = scalar_lea.vmem [#allocation2], %s371_s24 }
  0x23   : > { %s302_s30 = sshll.u32 %s163_s29, 4  ;;  %s303_s30 = int_to_ptr.vmem [resolvable:$true] %s302_s30 }
  0x6f   : > { %v278_v22 = vpop.permute.xlu2 %277 }
  0x77   : > { %v283_v31 = vpop.permute.xlu2 %282 }
  0x8c   : > { %v190_v9 = vpop.permute.xlu1 %189  ;;  %v248_v10 = vpop.permute.xlu0 %247 }
  0x94   : > { %v192_v11 = vpop.permute.xlu1 %191  ;;  %v250_v12 = vpop.permute.xlu0 %249 }
  0x95   : > { %v194_v13 = vsel %vm193_vm2, %v190_v9, %v192_v11  ;;  %v252_v14 = vsel %vm251_vm3, %v248_v10, %v250_v12 }
  0x96   : > { %v201_v15 = vsel %vm199_vm0, %v194_v13, 0  ;;  %v257_v16 = vsel %vm199_vm0, %v252_v14, 0 }
  0x97   : > { %210 = vmatpush.bf16.msra.mxu0 %v201_v15  ;;  %266 = vmatpush.bf16.msra.mxu2 %v257_v16 }
  0x9a   : > { %378 = vmatmul.msk.bf16.vlgmr.msra.gmra.mxu0 %vm195_vm1, %v396_v17  ;;  %388 = vmatmul.msk.bf16.vlgmr.msra.gmra.mxu2 %vm195_vm1, %v397_v18 }
  0x9b   : > { %v237_v20 = vpop.f32.mrf.mxu1 }
  0xa3   : > { %v239_v27 = vpop.f32.mrf.mxu1 }
 0x117   : > { %v212_v19 = vpop.f32.mrf.mxu0 }
 0x118   : > { %v238_v21 = vadd.f32 %v237_v20, %v212_v19 }
 0x11d   : > { %v268_v23 = vpop.f32.mrf.mxu2 }
 0x11e   : > { %v273_v24 = vadd.f32 %v268_v23, %v238_v21 }
 0x11f   : > { %v214_v26 = vpop.f32.mrf.mxu0 }
 0x120   : > { %v285_v25 = vadd.f32 %v278_v22, %v273_v24  ;;  %v240_v28 = vadd.f32 %v239_v27, %v214_v26 }
 0x122   : > { %287 = vst [vmem:[%s163_s29] sm:$0xff] %v285_v25 }
 0x125   : > { %v270_v29 = vpop.f32.mrf.mxu2 }
 0x126   : > { %v274_v30 = vadd.f32 %v270_v29, %v240_v28 }
 0x128   : > { %v286_v32 = vadd.f32 %v283_v31, %v274_v30 }
 0x12a   : > { %288 = vst [vmem:[%s163_s29 + $0x8] sm:$0xff] %v286_v32 }
 0x12b   : > { %472 = shalt.err (!%p469_p3)
}
 0x12c   : > { %s512_s17 = smov 128   ;;  %s513_s19 = smov 8  }
 0x12d   : > { %399 = dma.vmem_to_hbm [thread:$0]  (%p572_p5), %s303_s30, 256, %s305_s4, %s290_s16, %s512_s17, %s512_s17, %s513_s19  }
 0x12e PF: > { %p405_p4 = scmp.ge.s32.totalorder %s507_s15, 2  ;;  %s319_s20 = sand.u32 1, %s495_s12  }
 0x12f   : > { %s320_s24 = scalar_lea.sflag [#allocation3], %s319_s20 }
 0x130   : > { %p402_p7 = pnand %p405_p4, %p576_p6 }
 0x132   : > { %p403_p8 = pneg %p402_p7 }
 0x134   : > { %490 = dma.done.wait (%p403_p8), %s320_s24, 256  }
 0x135   : > { %492 = vsyncadd (%p403_p8), %s320_s24, 4294967040  ;;  %p13_p9 = scmp.ge.s32.totalorder %s559_s18, 4   ;;  %s646_s12 = smov %s499_s13 }
 0x136   : > { %s647_s13 = smov %s503_s14  ;;  %s648_s14 = smov %s570_s21 }
 0x137   : > { %s649_s15 = smov %s559_s18  ;;  %15 = sbr.rel (!%p13_p9) target bundleno = 3 (0x3), region = 67 }
 0x13c   :  { %326 = vsyncpa [#allocation3], 1 }
 0x13d   :  { %328 = vsyncpa [#allocation3 + $0x1], 1 }

</bundles_post_ra>
